<compile_context>
chip_gen: v6e
topology: v6e:2x2x1
jax: 0.10.0
libtpu: 0.0.40
codegen_flags: <defaults>
</compile_context>

<pallas_src>
import math
import jax
import jax.numpy as jnp
from jax.experimental import pallas as pl
from jax.experimental.pallas import tpu as pltpu

BN_EPS = 1e-5
PAD = 128          # lane width: every feature dim zero-padded to 128
MAX_TILE_B = 256   # batch tile (rows per grid step) for large batches


def _round_up(x, m):
    return (x + m - 1) // m * m


# ------------------------------ fused kernel --------------------------------

def _make_fused_kernel(block_kinds):
    """Whole network (all residual blocks + both heads) as one kernel body.

    Refs:
      x_ref    (TILE_B, PAD)       f32   activation tile
      w1_ref   (nb, PAD, 2*PAD)    bf16  cols [0:PAD)=w1, [PAD:2PAD)=ws (or 0)
      w2_ref   (nb+1, PAD, PAD)    bf16  per-block w2; last plane = head (fcs|fc_aux)
      b_ref    (R, PAD)            f32   bias rows: per block b1, b2 [, bs]; last = head
      head_ref (TILE_B, PAD)       f32
      feat_ref (TILE_B, PAD)       f32
    """
    nb = len(block_kinds)

    def kernel(x_ref, w1_ref, w2_ref, b_ref, head_ref, feat_ref):
        x = x_ref[...]                                           # (TB, PAD) f32
        row = 0
        for p, kind in enumerate(block_kinds):
            b1 = b_ref[pl.ds(row, 1), :]                         # (1, PAD)
            b2 = b_ref[pl.ds(row + 1, 1), :]
            # Fused first matmul: x @ [w1 || ws] -> one MXU issue, split free.
            y = jnp.dot(x.astype(jnp.bfloat16), w1_ref[p],
                        preferred_element_type=jnp.float32)      # (TB, 2*PAD)
            # left: Linear -> Dropout(identity, eval) -> BN -> ReLU
            h = jnp.maximum(y[:, :PAD] + b1, 0.0)
            if kind == "shortcut":                               # Linear -> BN shortcut
                res = y[:, PAD:] + b_ref[pl.ds(row + 2, 1), :]
                row += 3
            else:                                                # identity shortcut
                res = x
                row += 2
            # left (cont.): Linear -> BN
            z = jnp.dot(h.astype(jnp.bfloat16), w2_ref[p],
                        preferred_element_type=jnp.float32)
            x = jnp.maximum(z + b2 + res, 0.0)
        feat_ref[...] = x
        head_ref[...] = (jnp.dot(x.astype(jnp.bfloat16), w2_ref[nb],
                                 preferred_element_type=jnp.float32)
                         + b_ref[pl.ds(row, 1), :])
    return kernel


def resnet1d_forward(params, x_):
    assert x_.ndim == 2
    B, indim = x_.shape
    kinds = params["kinds"]

    tile_b = _round_up(B, 8) if B <= MAX_TILE_B else MAX_TILE_B
    b_pad = _round_up(B, tile_b)
    x_pad = jnp.pad(x_.astype(jnp.float32), ((0, b_pad - B), (0, PAD - indim)))

    act_spec = pl.BlockSpec((tile_b, PAD), lambda i: (i, 0))
    # Constant index_maps -> parameter stacks DMA'd once, VMEM-resident after.
    w1_spec = pl.BlockSpec(params["w1"].shape, lambda i: (0, 0, 0))
    w2_spec = pl.BlockSpec(params["w2"].shape, lambda i: (0, 0, 0))
    b_spec = pl.BlockSpec(params["bias"].shape, lambda i: (0, 0))

    head_pad, feat_pad = pl.pallas_call(
        _make_fused_kernel(kinds),
        grid=(b_pad // tile_b,),
        in_specs=[act_spec, w1_spec, w2_spec, b_spec],
        out_specs=(act_spec, act_spec),
        out_shape=(jax.ShapeDtypeStruct((b_pad, PAD), jnp.float32),
                   jax.ShapeDtypeStruct((b_pad, PAD), jnp.float32)),
        compiler_params=pltpu.CompilerParams(
            dimension_semantics=("parallel",)),   # shards batch tiles on v7x megacore
    )(x_pad, params["w1"], params["w2"], params["bias"])

    n_main = params["num_class"] - 1
    out = head_pad[:B, :n_main]
    out_aux = head_pad[:B, n_main:n_main + 2]
    feat = feat_pad[:B, :params["feat_dim"]]
    return out, out_aux, feat


# --------------------------- parameter construction --------------------------

def _init_linear(key, in_dim, out_dim):
    # PyTorch nn.Linear default init: U(-1/sqrt(fan_in), 1/sqrt(fan_in))
    k = 1.0 / math.sqrt(in_dim)
    kw, kb = jax.random.split(key)
    w = jax.random.uniform(kw, (in_dim, out_dim), jnp.float32, -k, k)
    b = jax.random.uniform(kb, (out_dim,), jnp.float32, -k, k)
    return w, b


def _fold_bn(w, b):
    # Freshly-initialized BatchNorm1d, eval mode: gamma=1, beta=0, mean=0, var=1
    scale = 1.0 / math.sqrt(1.0 + BN_EPS)
    return w * scale, b * scale


def _pad_w(w):
    i, o = w.shape
    return jnp.pad(w, ((0, PAD - i), (0, PAD - o)))


def _pad_b(b):
    return jnp.pad(b, (0, PAD - b.shape[0]))


def _linear_bn(key, in_dim, out_dim):
    w, b = _init_linear(key, in_dim, out_dim)
    w, b = _fold_bn(w, b)
    return _pad_w(w), _pad_b(b)


def init_resnet1d(key, indim, channels, blocks, num_class):
    kinds, w1_planes, w2_planes, bias_rows = [], [], [], []
    in_c = indim
    for block_num, out_c in zip(blocks, channels):
        for j in range(block_num):
            key, k1, k2, ks = jax.random.split(key, 4)
            w1, b1 = _linear_bn(k1, in_c if j == 0 else out_c, out_c)
            w2, b2 = _linear_bn(k2, out_c, out_c)
            if j == 0:
                # first block of each layer: projection shortcut (Linear + BN)
                ws, bs = _linear_bn(ks, in_c, out_c)
                kinds.append("shortcut")
                w1_planes.append(jnp.concatenate([w1, ws], axis=1))   # N-concat fusion
                bias_rows += [b1, b2, bs]
            else:
                kinds.append("identity")
                w1_planes.append(jnp.concatenate([w1, jnp.zeros_like(w1)], axis=1))
                bias_rows += [b1, b2]
            w2_planes.append(w2)
        in_c = out_c

    # heads: fcs (num_class-1) and fc_aux (2) concatenated into one matmul plane
    key, kf, ka = jax.random.split(key, 3)
    wf, bf = _init_linear(kf, channels[-1], num_class - 1)
    wa, ba = _init_linear(ka, channels[-1], 2)
    w2_planes.append(_pad_w(jnp.concatenate([wf, wa], axis=1)))
    bias_rows.append(_pad_b(jnp.concatenate([bf, ba], axis=0)))

    return {
        "kinds": tuple(kinds),
        "w1": jnp.stack(w1_planes).astype(jnp.bfloat16),   # (nb, 128, 256)
        "w2": jnp.stack(w2_planes).astype(jnp.bfloat16),   # (nb+1, 128, 128)
        "bias": jnp.stack(bias_rows),                       # (R, 128) f32
        "num_class": num_class,
        "feat_dim": channels[-1],
    }


# ------------------------------ references -----------------------------------

def _ref_forward(params, x_):
    """Mirrors the kernel math exactly (bf16 weights + bf16 activation casts)."""
    x = jnp.pad(x_.astype(jnp.float32), ((0, 0), (0, PAD - x_.shape[1])))
    w1, w2, bias, kinds = params["w1"], params["w2"], params["bias"], params["kinds"]
    row = 0
    for p, kind in enumerate(kinds):
        b1, b2 = bias[row][None, :], bias[row + 1][None, :]
        y = jnp.dot(x.astype(jnp.bfloat16), w1[p], preferred_element_type=jnp.float32)
        h = jnp.maximum(y[:, :PAD] + b1, 0.0)
        if kind == "shortcut":
            res = y[:, PAD:] + bias[row + 2][None, :]
            row += 3
        else:
            res = x
            row += 2
        z = jnp.dot(h.astype(jnp.bfloat16), w2[p], preferred_element_type=jnp.float32)
        x = jnp.maximum(z + b2 + res, 0.0)
    head = (jnp.dot(x.astype(jnp.bfloat16), w2[len(kinds)],
                    preferred_element_type=jnp.float32) + bias[row][None, :])
    n = params["num_class"] - 1
    return head[:, :n], head[:, n:n + 2], x[:, :params["feat_dim"]]


def _ref_forward_f32(params, x_):
    """Pure-f32 semantic reference (weights de-quantized) for a loose sanity check."""
    x = jnp.pad(x_.astype(jnp.float32), ((0, 0), (0, PAD - x_.shape[1])))
    w1 = params["w1"].astype(jnp.float32)
    w2 = params["w2"].astype(jnp.float32)
    bias, kinds = params["bias"], params["kinds"]
    row = 0
    for p, kind in enumerate(kinds):
        b1, b2 = bias[row][None, :], bias[row + 1][None, :]
        y = x @ w1[p]
        h = jnp.maximum(y[:, :PAD] + b1, 0.0)
        if kind == "shortcut":
            res = y[:, PAD:] + bias[row + 2][None, :]
            row += 3
        else:
            res = x
            row += 2
        x = jnp.maximum(h @ w2[p] + b2 + res, 0.0)
    head = x @ w2[len(kinds)] + bias[row][None, :]
    n = params["num_class"] - 1
    return head[:, :n], head[:, n:n + 2], x[:, :params["feat_dim"]]


# ---------------------------------- main -------------------------------------

if __name__ == "__main__":
    # small shapes consistent with the module's 2-D (batch, features) forward
    B, INDIM = 8, 24
    CHANNELS = [16, 32, 64]
    BLOCKS = [2, 1, 1]
    NUM_CLASS = 9

    key = jax.random.PRNGKey(0)
    kp, kx = jax.random.split(key)
    params = init_resnet1d(kp, INDIM, CHANNELS, BLOCKS, NUM_CLASS)
    x = jax.random.normal(kx, (B, INDIM), jnp.float32)

    out, out_aux, feat = resnet1d_forward(params, x)
    jax.block_until_ready((out, out_aux, feat))

    assert out.shape == (B, NUM_CLASS - 1)
    assert out_aux.shape == (B, 2)
    assert feat.shape == (B, CHANNELS[-1])

    # tight check against the bf16-mirrored reference (kernel correctness)
    r_out, r_aux, r_feat = _ref_forward(params, x)
    assert jnp.allclose(out, r_out, atol=1e-3, rtol=1e-3)
    assert jnp.allclose(out_aux, r_aux, atol=1e-3, rtol=1e-3)
    assert jnp.allclose(feat, r_feat, atol=1e-3, rtol=1e-3)

    # loose check against pure-f32 math (bf16 quantization sanity)
    f_out, f_aux, f_feat = _ref_forward_f32(params, x)
    assert jnp.allclose(out, f_out, atol=5e-2, rtol=5e-2)
    assert jnp.allclose(out_aux, f_aux, atol=5e-2, rtol=5e-2)
    assert jnp.allclose(feat, f_feat, atol=5e-2, rtol=5e-2)

    print("KERNEL_OK")
</pallas_src>

<mosaic_0001>
module attributes {stable_mosaic.version = 11 : i64} {
  func.func @kernel(%arg0: i32, %arg1: memref<8x128xf32, #tpu.memory_space<vmem>>, %arg2: memref<4x128x256xbf16, #tpu.memory_space<vmem>>, %arg3: memref<5x128x128xbf16, #tpu.memory_space<vmem>>, %arg4: memref<12x128xf32, #tpu.memory_space<vmem>>, %arg5: memref<8x128xf32, #tpu.memory_space<vmem>>, %arg6: memref<8x128xf32, #tpu.memory_space<vmem>>) attributes {dimension_semantics = [#tpu.dimension_semantics<parallel>], iteration_bounds = array<i64: 1>, scalar_prefetch = 0 : i64, scratch_operands = 0 : i64, tpu.core_type = #tpu.core_type<tc>, window_params = [{transform_indices = @transform_0, window_bounds = array<i64: 8, 128>}, {pipeline_mode = #tpu.pipeline_mode<synchronous>, transform_indices = @transform_1, window_bounds = array<i64: 4, 128, 256>}, {pipeline_mode = #tpu.pipeline_mode<synchronous>, transform_indices = @transform_2, window_bounds = array<i64: 5, 128, 128>}, {pipeline_mode = #tpu.pipeline_mode<synchronous>, transform_indices = @transform_3, window_bounds = array<i64: 12, 128>}, {transform_indices = @transform_4, window_bounds = array<i64: 8, 128>}, {transform_indices = @transform_5, window_bounds = array<i64: 8, 128>}]} {
    %c0 = arith.constant 0 : index
    %c0_0 = arith.constant 0 : index
    %0 = vector.load %arg1[%c0, %c0_0] : memref<8x128xf32, #tpu.memory_space<vmem>>, vector<8x128xf32>
    %c0_1 = arith.constant 0 : index
    %c0_2 = arith.constant 0 : index
    %1 = vector.load %arg4[%c0_1, %c0_2] : memref<12x128xf32, #tpu.memory_space<vmem>>, vector<1x128xf32>
    %c1 = arith.constant 1 : index
    %c0_3 = arith.constant 0 : index
    %2 = vector.load %arg4[%c1, %c0_3] : memref<12x128xf32, #tpu.memory_space<vmem>>, vector<1x128xf32>
    %3 = arith.truncf %0 : vector<8x128xf32> to vector<8x128xbf16>
    %c0_4 = arith.constant 0 : index
    %c0_5 = arith.constant 0 : index
    %c0_6 = arith.constant 0 : index
    %4 = vector.load %arg2[%c0_4, %c0_5, %c0_6] : memref<4x128x256xbf16, #tpu.memory_space<vmem>>, vector<1x128x256xbf16>
    %5 = vector.shape_cast %4 : vector<1x128x256xbf16> to vector<128x256xbf16>
    %cst = arith.constant dense<0.000000e+00> : vector<8x256xf32>
    %6 = tpu.matmul %3, %5, %cst {dimension_numbers = #tpu.dot_dimension_numbers<[1], [0], [0], [1], [0, 0, 1, 1], [], []>} : vector<8x128xbf16>, vector<128x256xbf16>, vector<8x256xf32> -> vector<8x256xf32>
    %7 = vector.extract_strided_slice %6 {offsets = [0, 0], sizes = [8, 128], strides = [1, 1]} : vector<8x256xf32> to vector<8x128xf32>
    %8 = vector.broadcast %1 : vector<1x128xf32> to vector<8x128xf32>
    %9 = arith.addf %7, %8 : vector<8x128xf32>
    %cst_7 = arith.constant 0.000000e+00 : f32
    %10 = vector.broadcast %cst_7 : f32 to vector<8x128xf32>
    %11 = arith.maximumf %9, %10 : vector<8x128xf32>
    %12 = vector.extract_strided_slice %6 {offsets = [0, 128], sizes = [8, 128], strides = [1, 1]} : vector<8x256xf32> to vector<8x128xf32>
    %c2 = arith.constant 2 : index
    %c0_8 = arith.constant 0 : index
    %13 = vector.load %arg4[%c2, %c0_8] : memref<12x128xf32, #tpu.memory_space<vmem>>, vector<1x128xf32>
    %14 = vector.broadcast %13 : vector<1x128xf32> to vector<8x128xf32>
    %15 = arith.addf %12, %14 : vector<8x128xf32>
    %16 = arith.truncf %11 : vector<8x128xf32> to vector<8x128xbf16>
    %c0_9 = arith.constant 0 : index
    %c0_10 = arith.constant 0 : index
    %c0_11 = arith.constant 0 : index
    %17 = vector.load %arg3[%c0_9, %c0_10, %c0_11] : memref<5x128x128xbf16, #tpu.memory_space<vmem>>, vector<1x128x128xbf16>
    %18 = vector.shape_cast %17 : vector<1x128x128xbf16> to vector<128x128xbf16>
    %cst_12 = arith.constant dense<0.000000e+00> : vector<8x128xf32>
    %19 = tpu.matmul %16, %18, %cst_12 {dimension_numbers = #tpu.dot_dimension_numbers<[1], [0], [0], [1], [0, 0, 1, 1], [], []>} : vector<8x128xbf16>, vector<128x128xbf16>, vector<8x128xf32> -> vector<8x128xf32>
    %20 = vector.broadcast %2 : vector<1x128xf32> to vector<8x128xf32>
    %21 = arith.addf %19, %20 : vector<8x128xf32>
    %22 = arith.addf %21, %15 : vector<8x128xf32>
    %cst_13 = arith.constant 0.000000e+00 : f32
    %23 = vector.broadcast %cst_13 : f32 to vector<8x128xf32>
    %24 = arith.maximumf %22, %23 : vector<8x128xf32>
    %c3 = arith.constant 3 : index
    %c0_14 = arith.constant 0 : index
    %25 = vector.load %arg4[%c3, %c0_14] : memref<12x128xf32, #tpu.memory_space<vmem>>, vector<1x128xf32>
    %c4 = arith.constant 4 : index
    %c0_15 = arith.constant 0 : index
    %26 = vector.load %arg4[%c4, %c0_15] : memref<12x128xf32, #tpu.memory_space<vmem>>, vector<1x128xf32>
    %27 = arith.truncf %24 : vector<8x128xf32> to vector<8x128xbf16>
    %c1_16 = arith.constant 1 : index
    %c0_17 = arith.constant 0 : index
    %c0_18 = arith.constant 0 : index
    %28 = vector.load %arg2[%c1_16, %c0_17, %c0_18] : memref<4x128x256xbf16, #tpu.memory_space<vmem>>, vector<1x128x256xbf16>
    %29 = vector.shape_cast %28 : vector<1x128x256xbf16> to vector<128x256xbf16>
    %cst_19 = arith.constant dense<0.000000e+00> : vector<8x256xf32>
    %30 = tpu.matmul %27, %29, %cst_19 {dimension_numbers = #tpu.dot_dimension_numbers<[1], [0], [0], [1], [0, 0, 1, 1], [], []>} : vector<8x128xbf16>, vector<128x256xbf16>, vector<8x256xf32> -> vector<8x256xf32>
    %31 = vector.extract_strided_slice %30 {offsets = [0, 0], sizes = [8, 128], strides = [1, 1]} : vector<8x256xf32> to vector<8x128xf32>
    %32 = vector.broadcast %25 : vector<1x128xf32> to vector<8x128xf32>
    %33 = arith.addf %31, %32 : vector<8x128xf32>
    %cst_20 = arith.constant 0.000000e+00 : f32
    %34 = vector.broadcast %cst_20 : f32 to vector<8x128xf32>
    %35 = arith.maximumf %33, %34 : vector<8x128xf32>
    %36 = arith.truncf %35 : vector<8x128xf32> to vector<8x128xbf16>
    %c1_21 = arith.constant 1 : index
    %c0_22 = arith.constant 0 : index
    %c0_23 = arith.constant 0 : index
    %37 = vector.load %arg3[%c1_21, %c0_22, %c0_23] : memref<5x128x128xbf16, #tpu.memory_space<vmem>>, vector<1x128x128xbf16>
    %38 = vector.shape_cast %37 : vector<1x128x128xbf16> to vector<128x128xbf16>
    %cst_24 = arith.constant dense<0.000000e+00> : vector<8x128xf32>
    %39 = tpu.matmul %36, %38, %cst_24 {dimension_numbers = #tpu.dot_dimension_numbers<[1], [0], [0], [1], [0, 0, 1, 1], [], []>} : vector<8x128xbf16>, vector<128x128xbf16>, vector<8x128xf32> -> vector<8x128xf32>
    %40 = vector.broadcast %26 : vector<1x128xf32> to vector<8x128xf32>
    %41 = arith.addf %39, %40 : vector<8x128xf32>
    %42 = arith.addf %41, %24 : vector<8x128xf32>
    %cst_25 = arith.constant 0.000000e+00 : f32
    %43 = vector.broadcast %cst_25 : f32 to vector<8x128xf32>
    %44 = arith.maximumf %42, %43 : vector<8x128xf32>
    %c5 = arith.constant 5 : index
    %c0_26 = arith.constant 0 : index
    %45 = vector.load %arg4[%c5, %c0_26] : memref<12x128xf32, #tpu.memory_space<vmem>>, vector<1x128xf32>
    %c6 = arith.constant 6 : index
    %c0_27 = arith.constant 0 : index
    %46 = vector.load %arg4[%c6, %c0_27] : memref<12x128xf32, #tpu.memory_space<vmem>>, vector<1x128xf32>
    %47 = arith.truncf %44 : vector<8x128xf32> to vector<8x128xbf16>
    %c2_28 = arith.constant 2 : index
    %c0_29 = arith.constant 0 : index
    %c0_30 = arith.constant 0 : index
    %48 = vector.load %arg2[%c2_28, %c0_29, %c0_30] : memref<4x128x256xbf16, #tpu.memory_space<vmem>>, vector<1x128x256xbf16>
    %49 = vector.shape_cast %48 : vector<1x128x256xbf16> to vector<128x256xbf16>
    %cst_31 = arith.constant dense<0.000000e+00> : vector<8x256xf32>
    %50 = tpu.matmul %47, %49, %cst_31 {dimension_numbers = #tpu.dot_dimension_numbers<[1], [0], [0], [1], [0, 0, 1, 1], [], []>} : vector<8x128xbf16>, vector<128x256xbf16>, vector<8x256xf32> -> vector<8x256xf32>
    %51 = vector.extract_strided_slice %50 {offsets = [0, 0], sizes = [8, 128], strides = [1, 1]} : vector<8x256xf32> to vector<8x128xf32>
    %52 = vector.broadcast %45 : vector<1x128xf32> to vector<8x128xf32>
    %53 = arith.addf %51, %52 : vector<8x128xf32>
    %cst_32 = arith.constant 0.000000e+00 : f32
    %54 = vector.broadcast %cst_32 : f32 to vector<8x128xf32>
    %55 = arith.maximumf %53, %54 : vector<8x128xf32>
    %56 = vector.extract_strided_slice %50 {offsets = [0, 128], sizes = [8, 128], strides = [1, 1]} : vector<8x256xf32> to vector<8x128xf32>
    %c7 = arith.constant 7 : index
    %c0_33 = arith.constant 0 : index
    %57 = vector.load %arg4[%c7, %c0_33] : memref<12x128xf32, #tpu.memory_space<vmem>>, vector<1x128xf32>
    %58 = vector.broadcast %57 : vector<1x128xf32> to vector<8x128xf32>
    %59 = arith.addf %56, %58 : vector<8x128xf32>
    %60 = arith.truncf %55 : vector<8x128xf32> to vector<8x128xbf16>
    %c2_34 = arith.constant 2 : index
    %c0_35 = arith.constant 0 : index
    %c0_36 = arith.constant 0 : index
    %61 = vector.load %arg3[%c2_34, %c0_35, %c0_36] : memref<5x128x128xbf16, #tpu.memory_space<vmem>>, vector<1x128x128xbf16>
    %62 = vector.shape_cast %61 : vector<1x128x128xbf16> to vector<128x128xbf16>
    %cst_37 = arith.constant dense<0.000000e+00> : vector<8x128xf32>
    %63 = tpu.matmul %60, %62, %cst_37 {dimension_numbers = #tpu.dot_dimension_numbers<[1], [0], [0], [1], [0, 0, 1, 1], [], []>} : vector<8x128xbf16>, vector<128x128xbf16>, vector<8x128xf32> -> vector<8x128xf32>
    %64 = vector.broadcast %46 : vector<1x128xf32> to vector<8x128xf32>
    %65 = arith.addf %63, %64 : vector<8x128xf32>
    %66 = arith.addf %65, %59 : vector<8x128xf32>
    %cst_38 = arith.constant 0.000000e+00 : f32
    %67 = vector.broadcast %cst_38 : f32 to vector<8x128xf32>
    %68 = arith.maximumf %66, %67 : vector<8x128xf32>
    %c8 = arith.constant 8 : index
    %c0_39 = arith.constant 0 : index
    %69 = vector.load %arg4[%c8, %c0_39] : memref<12x128xf32, #tpu.memory_space<vmem>>, vector<1x128xf32>
    %c9 = arith.constant 9 : index
    %c0_40 = arith.constant 0 : index
    %70 = vector.load %arg4[%c9, %c0_40] : memref<12x128xf32, #tpu.memory_space<vmem>>, vector<1x128xf32>
    %71 = arith.truncf %68 : vector<8x128xf32> to vector<8x128xbf16>
    %c3_41 = arith.constant 3 : index
    %c0_42 = arith.constant 0 : index
    %c0_43 = arith.constant 0 : index
    %72 = vector.load %arg2[%c3_41, %c0_42, %c0_43] : memref<4x128x256xbf16, #tpu.memory_space<vmem>>, vector<1x128x256xbf16>
    %73 = vector.shape_cast %72 : vector<1x128x256xbf16> to vector<128x256xbf16>
    %cst_44 = arith.constant dense<0.000000e+00> : vector<8x256xf32>
    %74 = tpu.matmul %71, %73, %cst_44 {dimension_numbers = #tpu.dot_dimension_numbers<[1], [0], [0], [1], [0, 0, 1, 1], [], []>} : vector<8x128xbf16>, vector<128x256xbf16>, vector<8x256xf32> -> vector<8x256xf32>
    %75 = vector.extract_strided_slice %74 {offsets = [0, 0], sizes = [8, 128], strides = [1, 1]} : vector<8x256xf32> to vector<8x128xf32>
    %76 = vector.broadcast %69 : vector<1x128xf32> to vector<8x128xf32>
    %77 = arith.addf %75, %76 : vector<8x128xf32>
    %cst_45 = arith.constant 0.000000e+00 : f32
    %78 = vector.broadcast %cst_45 : f32 to vector<8x128xf32>
    %79 = arith.maximumf %77, %78 : vector<8x128xf32>
    %80 = vector.extract_strided_slice %74 {offsets = [0, 128], sizes = [8, 128], strides = [1, 1]} : vector<8x256xf32> to vector<8x128xf32>
    %c10 = arith.constant 10 : index
    %c0_46 = arith.constant 0 : index
    %81 = vector.load %arg4[%c10, %c0_46] : memref<12x128xf32, #tpu.memory_space<vmem>>, vector<1x128xf32>
    %82 = vector.broadcast %81 : vector<1x128xf32> to vector<8x128xf32>
    %83 = arith.addf %80, %82 : vector<8x128xf32>
    %84 = arith.truncf %79 : vector<8x128xf32> to vector<8x128xbf16>
    %c3_47 = arith.constant 3 : index
    %c0_48 = arith.constant 0 : index
    %c0_49 = arith.constant 0 : index
    %85 = vector.load %arg3[%c3_47, %c0_48, %c0_49] : memref<5x128x128xbf16, #tpu.memory_space<vmem>>, vector<1x128x128xbf16>
    %86 = vector.shape_cast %85 : vector<1x128x128xbf16> to vector<128x128xbf16>
    %cst_50 = arith.constant dense<0.000000e+00> : vector<8x128xf32>
    %87 = tpu.matmul %84, %86, %cst_50 {dimension_numbers = #tpu.dot_dimension_numbers<[1], [0], [0], [1], [0, 0, 1, 1], [], []>} : vector<8x128xbf16>, vector<128x128xbf16>, vector<8x128xf32> -> vector<8x128xf32>
    %88 = vector.broadcast %70 : vector<1x128xf32> to vector<8x128xf32>
    %89 = arith.addf %87, %88 : vector<8x128xf32>
    %90 = arith.addf %89, %83 : vector<8x128xf32>
    %cst_51 = arith.constant 0.000000e+00 : f32
    %91 = vector.broadcast %cst_51 : f32 to vector<8x128xf32>
    %92 = arith.maximumf %90, %91 : vector<8x128xf32>
    %c0_52 = arith.constant 0 : index
    %c0_53 = arith.constant 0 : index
    %93 = vector.load %arg6[%c0_52, %c0_53] : memref<8x128xf32, #tpu.memory_space<vmem>>, vector<8x128xf32>
    tpu.vector_store %arg6[%c0_52, %c0_53], %92 {strides = array<i32>} : memref<8x128xf32, #tpu.memory_space<vmem>>, vector<8x128xf32>,
    %94 = arith.truncf %92 : vector<8x128xf32> to vector<8x128xbf16>
    %c4_54 = arith.constant 4 : index
    %c0_55 = arith.constant 0 : index
    %c0_56 = arith.constant 0 : index
    %95 = vector.load %arg3[%c4_54, %c0_55, %c0_56] : memref<5x128x128xbf16, #tpu.memory_space<vmem>>, vector<1x128x128xbf16>
    %96 = vector.shape_cast %95 : vector<1x128x128xbf16> to vector<128x128xbf16>
    %cst_57 = arith.constant dense<0.000000e+00> : vector<8x128xf32>
    %97 = tpu.matmul %94, %96, %cst_57 {dimension_numbers = #tpu.dot_dimension_numbers<[1], [0], [0], [1], [0, 0, 1, 1], [], []>} : vector<8x128xbf16>, vector<128x128xbf16>, vector<8x128xf32> -> vector<8x128xf32>
    %c11 = arith.constant 11 : index
    %c0_58 = arith.constant 0 : index
    %98 = vector.load %arg4[%c11, %c0_58] : memref<12x128xf32, #tpu.memory_space<vmem>>, vector<1x128xf32>
    %99 = vector.broadcast %98 : vector<1x128xf32> to vector<8x128xf32>
    %100 = arith.addf %97, %99 : vector<8x128xf32>
    %c0_59 = arith.constant 0 : index
    %c0_60 = arith.constant 0 : index
    %101 = vector.load %arg5[%c0_59, %c0_60] : memref<8x128xf32, #tpu.memory_space<vmem>>, vector<8x128xf32>
    tpu.vector_store %arg5[%c0_59, %c0_60], %100 {strides = array<i32>} : memref<8x128xf32, #tpu.memory_space<vmem>>, vector<8x128xf32>,
    return
  }
  func.func @transform_0(%arg0: i32) -> (i32, i32) {
    %c0_i32 = arith.constant 0 : i32
    %c0_i32_0 = arith.constant 0 : i32
    return %arg0, %c0_i32 : i32, i32
  }
  func.func @transform_1(%arg0: i32) -> (i32, i32, i32) {
    %c0_i32 = arith.constant 0 : i32
    %c0_i32_0 = arith.constant 0 : i32
    %c0_i32_1 = arith.constant 0 : i32
    %c0_i32_2 = arith.constant 0 : i32
    return %c0_i32, %c0_i32_0, %c0_i32_1 : i32, i32, i32
  }
  func.func @transform_2(%arg0: i32) -> (i32, i32, i32) {
    %c0_i32 = arith.constant 0 : i32
    %c0_i32_0 = arith.constant 0 : i32
    %c0_i32_1 = arith.constant 0 : i32
    %c0_i32_2 = arith.constant 0 : i32
    return %c0_i32, %c0_i32_0, %c0_i32_1 : i32, i32, i32
  }
  func.func @transform_3(%arg0: i32) -> (i32, i32) {
    %c0_i32 = arith.constant 0 : i32
    %c0_i32_0 = arith.constant 0 : i32
    %c0_i32_1 = arith.constant 0 : i32
    return %c0_i32, %c0_i32_0 : i32, i32
  }
  func.func @transform_4(%arg0: i32) -> (i32, i32) {
    %c0_i32 = arith.constant 0 : i32
    %c0_i32_0 = arith.constant 0 : i32
    return %arg0, %c0_i32 : i32, i32
  }
  func.func @transform_5(%arg0: i32) -> (i32, i32) {
    %c0_i32 = arith.constant 0 : i32
    %c0_i32_0 = arith.constant 0 : i32
    return %arg0, %c0_i32 : i32, i32
  }
}

</mosaic_0001>

<bundles_post_ra>
// kernel: tpu_custom_call.1
= control target key start
LH: loop header
LB: loop body
LE: loop exit
PB: predicated region body
PF: predicated region fallthrough
CT: control target
= control target key end

     0   :  { %11 = vsyncpa [#allocation3], 0  ;;  %s1937_s0 = inlined_call_operand.hbm [shape: f32[8,128], index: 0, kind: input, shape index: {}]   ;;  %s1938_s1 = inlined_call_operand.hbm [shape: bf16[4,128,256], index: 1, kind: input, shape index: {}]   ;;  %s1939_s2 = inlined_call_operand.hbm [shape: bf16[5,128,128], index: 2, kind: input, shape index: {}]   ;;  %s1940_s3 = inlined_call_operand.hbm [shape: f32[12,128], index: 3, kind: input, shape index: {}]   ;;  %s1941_s4 = inlined_call_operand.hbm [shape: f32[8,128], index: 4, kind: output, shape index: {0}]   ;;  %s1942_s5 = inlined_call_operand.hbm [shape: f32[8,128], index: 5, kind: output, shape index: {1}]  }
   0x1   :  { %12 = vsyncpa [#allocation6], 0 }
   0x2   :  { %13 = vsyncpa [#allocation9], 0 }
   0x3   :  { %14 = vsyncpa [#allocation4], 0 }
   0x4   :  { %15 = vsyncpa [#allocation12], 0  ;;  %s1811_s18 = smov [#allocation5]  }
   0x5   :  { %s31_s19 = sshll.u32 %s1811_s18, 4  ;;  %s32_s19 = int_to_ptr.vmem [resolvable:$true] %s31_s19 }
   0x6   :  { %s1689_s20 = scalar_lea.vmem %s32_s19, 8192  ;;  %p1694_p1 = scmp.lt.s32.totalorder %s32_s19, %s32_s19 }
   0x7   :  { %p1690_p0 = scmp.ne.s32.totalorder %s32_s19, %s1689_s20  ;;  %p1695_p2 = scmp.lt.s32.totalorder %s1689_s20, %s1689_s20 }
   0x9   :  { %p1696_p3 = por %p1695_p2, %p1694_p1 }
   0xb   :  { %p1697_p4 = pnand %p1696_p3, %p1690_p0 }
   0xd   :  { %1700 = shalt.err (!%p1697_p4)
}
   0xe   :  { %s1812_s21 = smov 128   ;;  %s1813_s22 = smov 8  }
   0xf   :  { %37 = dma.hbm_to_vmem [thread:$0]  %s1938_s1, 8192, %s32_s19, [#allocation6], %s1812_s21, %s1812_s21, %s1813_s22  }
  0x10   :  { %s1814_s25 = smov [#allocation2]   ;;  %s1815_s27 = smov [#allocation7]  }
  0x11   :  { %s22_s26 = sshll.u32 %s1814_s25, 4  ;;  %s43_s28 = sshll.u32 %s1815_s27, 4  ;;  %s23_s26 = int_to_ptr.vmem [resolvable:$true] %s22_s26  ;;  %s44_s28 = int_to_ptr.vmem [resolvable:$true] %s43_s28 }
  0x12   :  { %s1709_s29 = scalar_lea.vmem %s23_s26, 128  ;;  %p1714_p6 = scmp.lt.s32.totalorder %s23_s26, %s23_s26 }
  0x13   :  { %p1710_p5 = scmp.ne.s32.totalorder %s23_s26, %s1709_s29  ;;  %p1715_p7 = scmp.lt.s32.totalorder %s1709_s29, %s1709_s29 }
  0x15   :  { %p1716_p8 = por %p1715_p7, %p1714_p6 }
  0x17   :  { %p1717_p9 = pnand %p1716_p8, %p1710_p5 }
  0x19   :  { %1720 = shalt.err (!%p1717_p9)
}
  0x1a   :  { %25 = dma.hbm_to_vmem [thread:$0]  %s1937_s0, 128, %s23_s26, [#allocation3]  }
  0x1b   :  { %s1729_s7 = scalar_lea.vmem %s44_s28, 5120  ;;  %p1734_p11 = scmp.lt.s32.totalorder %s44_s28, %s44_s28 }
  0x1c   :  { %p1730_p10 = scmp.ne.s32.totalorder %s44_s28, %s1729_s7  ;;  %p1735_p12 = scmp.lt.s32.totalorder %s1729_s7, %s1729_s7 }
  0x1e   :  { %p1736_p13 = por %p1735_p12, %p1734_p11 }
  0x20   :  { %p1737_p0 = pnand %p1736_p13, %p1730_p10 }
  0x22   :  { %1740 = shalt.err (!%p1737_p0)
}
  0x23   :  { %s1816_s1 = smov 64   ;;  %s1817_s8 = smov 4  }
  0x24   :  { %49 = dma.hbm_to_vmem [thread:$0]  %s1939_s2, 5120, %s44_s28, [#allocation6], %s1816_s1, %s1816_s1, %s1817_s8  }
  0x25   :  { %s1818_s11 = smov [#allocation8]  }
  0x26   :  { %s55_s12 = sshll.u32 %s1818_s11, 4  ;;  %s56_s12 = int_to_ptr.vmem [resolvable:$true] %s55_s12 }
  0x27   :  { %s1749_s13 = scalar_lea.vmem %s56_s12, 256  ;;  %p1754_p2 = scmp.lt.s32.totalorder %s56_s12, %s56_s12 }
  0x28   :  { %p1750_p1 = scmp.ne.s32.totalorder %s56_s12, %s1749_s13  ;;  %p1755_p3 = scmp.lt.s32.totalorder %s1749_s13, %s1749_s13 }
  0x2a   :  { %p1756_p4 = por %p1755_p3, %p1754_p2 }
  0x2c   :  { %p1757_p5 = pnand %p1756_p4, %p1750_p1 }
  0x2e   :  { %1760 = shalt.err (!%p1757_p5)
}
  0x2f   :  { %61 = dma.hbm_to_vmem [thread:$0]  %s1940_s3, 256, %s56_s12, [#allocation9], %s1812_s21, %s1812_s21, %s1813_s22  }
  0x30   :  { %1801 = dma.done.wait [#allocation3], 128  }
  0x31   :  { %1802 = vsyncadd [#allocation3], 4294967168 }
  0x32   :  { %1803 = dma.done.wait [#allocation6], 13312  }
  0x33   :  { %1804 = vsyncadd [#allocation6], 4294953984 }
  0x34   :  { %1805 = dma.done.wait [#allocation9], 256  }
  0x35   :  { %1806 = vsyncadd [#allocation9], 4294967040  ;;  %v1819_v0 = vmov 0   ;;  %v1820_v1 = vmov 0.0   ;;  %v1545_v2 = vld [vmem:[#allocation5 + $0x74] ss:$8 sps:$4 sm:$0xff]  }
  0x36   :  { %207 = vmatprep.mubr.bf16.mxu0 %v1819_v0  ;;  %1432 = vmatprep.subr.bf16.mxu1 %v1820_v1  ;;  %v1547_v3 = vld [vmem:[#allocation5 + $0x70] ss:$8 sps:$4 sm:$0xff]   ;;  %v1548_v4 = vld [vmem:[#allocation5 + $0x64] ss:$8 sps:$4 sm:$0xff]   ;;  %v1550_v5 = vld [vmem:[#allocation5 + $0x60] ss:$8 sps:$4 sm:$0xff]  }
  0x37   :  { %175 = vmatprep.subr.bf16.mxu0 %v1545_v2  ;;  %v1551_v6 = vld [vmem:[#allocation5 + $0x54] ss:$8 sps:$4 sm:$0xff]   ;;  %v1553_v7 = vld [vmem:[#allocation5 + $0x50] ss:$8 sps:$4 sm:$0xff]   ;;  %v1554_v8 = vld [vmem:[#allocation5 + $0x44] ss:$8 sps:$4 sm:$0xff]  }
  0x38   :  { %176 = vmatpush1.bf16.msra.mxu0 %v1547_v3  ;;  %v1556_v9 = vld [vmem:[#allocation5 + $0x40] ss:$8 sps:$4 sm:$0xff]   ;;  %v1569_v10 = vld [vmem:[#allocation7 + $0x38] sm:$0xff]   ;;  %v1570_v12 = vld [vmem:[#allocation7 + $0x30] sm:$0xff]   ;;  %vm1821_vm0 = vmmov 0   ;;  %s1822_s2 = smov [#allocation11]  }
  0x39   :  { %177 = vmatprep.subr.bf16.mxu0 %v1548_v4  ;;  %v1557_v11 = vld [vmem:[#allocation5 + $0x34] ss:$8 sps:$4 sm:$0xff]   ;;  %1433 = vmatpush3.bf16.msra.mxu1 %v1569_v10  ;;  %v1559_v13 = vld [vmem:[#allocation5 + $0x30] ss:$8 sps:$4 sm:$0xff]   ;;  %v1560_v14 = vld [vmem:[#allocation5 + $0x24] ss:$8 sps:$4 sm:$0xff]  }
  0x3a   :  { %1434 = vmatprep.subr.bf16.mxu1 %v1820_v1  ;;  %v1562_v15 = vld [vmem:[#allocation5 + $0x20] ss:$8 sps:$4 sm:$0xff]   ;;  %v1563_v17 = vld [vmem:[#allocation5 + $0x14] ss:$8 sps:$4 sm:$0xff]   ;;  %v1565_v19 = vld [vmem:[#allocation5 + $0x10] ss:$8 sps:$4 sm:$0xff]   ;;  %1448 = vmatprep.mubr.msk.bf16.mxu1 %vm1821_vm0, %v1820_v1 }
  0x3b   :  { %v1571_v16 = vld [vmem:[#allocation7 + $0x28] sm:$0xff]   ;;  %v1572_v18 = vld [vmem:[#allocation7 + $0x20] sm:$0xff]   ;;  %v1573_v21 = vld [vmem:[#allocation7 + $0x18] sm:$0xff]   ;;  %s1256_s3 = sshll.u32 %s1822_s2, 4  ;;  %s1257_s3 = int_to_ptr.vmem [resolvable:$true] %s1256_s3 }
  0x3c   :  { %178 = vmatpush1.bf16.msra.mxu0 %v1550_v5  ;;  %v1566_v20 = vld [vmem:[#allocation5 + $0x4] ss:$8 sps:$4 sm:$0xff]   ;;  %v1568_v22 = vld [vmem:[#allocation5] ss:$8 sps:$4 sm:$0xff]   ;;  %v75_v23 = vld [vmem:[#allocation2] sm:$0xff]  ;;  %s1761_s15 = scalar_lea.vmem %s1257_s3, 128  ;;  %p1766_p7 = scmp.lt.s32.totalorder %s1257_s3, %s1257_s3 }
  0x3d   :  { %179 = vmatprep.subr.bf16.mxu0 %v1551_v6  ;;  %1435 = vmatpush3.bf16.msra.mxu1 %v1570_v12  ;;  %v1574_v24 = vld [vmem:[#allocation7 + $0x10] sm:$0xff]   ;;  %v78_v25 = vpack.c.bf16 %v75_v23, %v75_v23  ;;  %v1575_v26 = vld [vmem:[#allocation7 + $0x8] sm:$0xff]   ;;  %v1576_v27 = vld [vmem:[#allocation7] sm:$0xff]   ;;  %p1762_p6 = scmp.ne.s32.totalorder %s1257_s3, %s1761_s15  ;;  %p1767_p8 = scmp.lt.s32.totalorder %s1761_s15, %s1761_s15 }
  0x3e   :  { %1436 = vmatprep.subr.bf16.mxu1 %v1820_v1  ;;  %v1577_v28 = vld [vmem:[#allocation5 + $0xf0] ss:$8 sps:$4 sm:$0xff]   ;;  %v1579_v29 = vld [vmem:[#allocation5 + $0xf4] ss:$8 sps:$4 sm:$0xff]   ;;  %v1582_v30 = vld [vmem:[#allocation5 + $0xe4] ss:$8 sps:$4 sm:$0xff]  }
  0x3f   :  { %v1580_v31 = vld [vmem:[#allocation5 + $0xe0] ss:$8 sps:$4 sm:$0xff]   ;;  %v1585_v32 = vld [vmem:[#allocation5 + $0xd4] ss:$8 sps:$4 sm:$0xff]   ;;  %v1583_v33 = vld [vmem:[#allocation5 + $0xd0] ss:$8 sps:$4 sm:$0xff]   ;;  %p1768_p9 = por %p1767_p8, %p1766_p7 }
  0x40   :  { %180 = vmatpush1.bf16.msra.mxu0 %v1553_v7  ;;  %v1588_v34 = vld [vmem:[#allocation5 + $0xc4] ss:$8 sps:$4 sm:$0xff]   ;;  %v1586_v35 = vld [vmem:[#allocation5 + $0xc0] ss:$8 sps:$4 sm:$0xff]   ;;  %v1591_v36 = vld [vmem:[#allocation5 + $0xb4] ss:$8 sps:$4 sm:$0xff]  }
  0x41   :  { %181 = vmatprep.subr.bf16.mxu0 %v1554_v8  ;;  %1437 = vmatpush3.bf16.msra.mxu1 %v1571_v16  ;;  %v1589_v37 = vld [vmem:[#allocation5 + $0xb0] ss:$8 sps:$4 sm:$0xff]   ;;  %v1594_v38 = vld [vmem:[#allocation5 + $0xa4] ss:$8 sps:$4 sm:$0xff]   ;;  %v1592_v39 = vld [vmem:[#allocation5 + $0xa0] ss:$8 sps:$4 sm:$0xff]   ;;  %p1769_p10 = pnand %p1768_p9, %p1762_p6 }
  0x42   :  { %1438 = vmatprep.subr.bf16.mxu1 %v1820_v1  ;;  %v1287_v40 = vld [vmem:[#allocation8] ss:$0 sm:$0xff]  ;;  %v1597_v48 = vld [vmem:[#allocation5 + $0x94] ss:$8 sps:$4 sm:$0xff]   ;;  %v1595_v49 = vld [vmem:[#allocation5 + $0x90] ss:$8 sps:$4 sm:$0xff]  }
  0x43   :  { %v1600_v50 = vld [vmem:[#allocation5 + $0x84] ss:$8 sps:$4 sm:$0xff]   ;;  %v1598_v51 = vld [vmem:[#allocation5 + $0x80] ss:$8 sps:$4 sm:$0xff]   ;;  %v1601_v52 = vld [vmem:[#allocation7 + $0x78] sm:$0xff]  }
  0x44   :  { %182 = vmatpush1.bf16.msra.mxu0 %v1556_v9  ;;  %v1602_v53 = vld [vmem:[#allocation7 + $0x70] sm:$0xff]   ;;  %v1603_v54 = vld [vmem:[#allocation7 + $0x68] sm:$0xff]   ;;  %v1604_v55 = vld [vmem:[#allocation7 + $0x60] sm:$0xff]  }
  0x45   :  { %183 = vmatprep.subr.bf16.mxu0 %v1557_v11  ;;  %1439 = vmatpush3.bf16.msra.mxu1 %v1572_v18  ;;  %v1605_v56 = vld [vmem:[#allocation7 + $0x58] sm:$0xff]   ;;  %v1606_v57 = vld [vmem:[#allocation7 + $0x50] sm:$0xff]   ;;  %v1288_v58 = vld [vmem:[#allocation8 + $0x2] ss:$0 sm:$0xff] }
  0x46   :  { %1440 = vmatprep.subr.bf16.mxu1 %v1820_v1  ;;  %v1289_v59 = vld [vmem:[#allocation8 + $0x1] ss:$0 sm:$0xff]  ;;  %v1607_v7 = vld [vmem:[#allocation7 + $0x48] sm:$0xff]   ;;  %v1609_v9 = vld [vmem:[#allocation5 + $0x170] ss:$8 sps:$4 sm:$0xff]  }
  0x47   :  { %v1608_v8 = vld [vmem:[#allocation7 + $0x40] sm:$0xff]   ;;  %v1611_v10 = vld [vmem:[#allocation5 + $0x174] ss:$8 sps:$4 sm:$0xff]   ;;  %v1621_v18 = vld [vmem:[#allocation5 + $0x130] ss:$8 sps:$4 sm:$0xff]  }
  0x48   :  { %184 = vmatpush1.bf16.msra.mxu0 %v1559_v13  ;;  %v1614_v11 = vld [vmem:[#allocation5 + $0x164] ss:$8 sps:$4 sm:$0xff]   ;;  %v1612_v12 = vld [vmem:[#allocation5 + $0x160] ss:$8 sps:$4 sm:$0xff]   ;;  %v1617_v13 = vld [vmem:[#allocation5 + $0x154] ss:$8 sps:$4 sm:$0xff]  }
  0x49   :  { %185 = vmatprep.subr.bf16.mxu0 %v1560_v14  ;;  %1441 = vmatpush3.bf16.msra.mxu1 %v1573_v21  ;;  %v1615_v14 = vld [vmem:[#allocation5 + $0x150] ss:$8 sps:$4 sm:$0xff]   ;;  %v1618_v16 = vld [vmem:[#allocation5 + $0x140] ss:$8 sps:$4 sm:$0xff]  }
  0x4a   :  { %1442 = vmatprep.subr.bf16.mxu1 %v1820_v1  ;;  %v1314_v21 = vld [vmem:[#allocation8 + $0x3] ss:$0 sm:$0xff] }
  0x4c   :  { %186 = vmatpush1.bf16.msra.mxu0 %v1562_v15  ;;  %v1620_v15 = vld [vmem:[#allocation5 + $0x144] ss:$8 sps:$4 sm:$0xff]  }
  0x4d   :  { %187 = vmatprep.subr.bf16.mxu0 %v1563_v17  ;;  %1443 = vmatpush3.bf16.msra.mxu1 %v1574_v24  ;;  %v1623_v17 = vld [vmem:[#allocation5 + $0x134] ss:$8 sps:$4 sm:$0xff]  }
  0x4e   :  { %1444 = vmatprep.subr.bf16.mxu1 %v1820_v1 }
  0x50   :  { %188 = vmatpush1.bf16.msra.mxu0 %v1565_v19  ;;  %v1626_v19 = vld [vmem:[#allocation5 + $0x124] ss:$8 sps:$4 sm:$0xff]  }
  0x51   :  { %189 = vmatprep.subr.bf16.mxu0 %v1566_v20  ;;  %1445 = vmatpush3.bf16.msra.mxu1 %v1575_v26  ;;  %v1624_v20 = vld [vmem:[#allocation5 + $0x120] ss:$8 sps:$4 sm:$0xff]  }
  0x52   :  { %1446 = vmatprep.subr.bf16.mxu1 %v1820_v1 }
  0x54   :  { %190 = vmatpush1.bf16.msra.mxu0 %v1568_v22 }
  0x55   :  { %1447 = vmatpush3.bf16.msra.mxu1 %v1576_v27  ;;  %439 = vmatprep.subr.bf16.mxu0 %v1579_v29  ;;  %v1629_v29 = vld [vmem:[#allocation5 + $0x114] ss:$8 sps:$4 sm:$0xff]  }
  0x56   :  { %1452 = vmatprep.subr.bf16.mxu1 %v1820_v1 }
  0x57   :  { %208 = vmatmul.mubr.bf16.vlgmr.msra.gmra.mxu0 %v78_v25 }
  0x58   :  { %471 = vmatprep.mubr.bf16.mxu0 %v1819_v0  ;;  %440 = vmatpush1.bf16.msra.mxu0 %v1577_v28 }
  0x59   :  { %441 = vmatprep.subr.bf16.mxu0 %v1582_v30  ;;  %v1627_v30 = vld [vmem:[#allocation5 + $0x110] ss:$8 sps:$4 sm:$0xff]  }
  0x5c   :  { %442 = vmatpush1.bf16.msra.mxu0 %v1580_v31  ;;  %v1632_v31 = vld [vmem:[#allocation5 + $0x104] ss:$8 sps:$4 sm:$0xff]  }
  0x5d   :  { %443 = vmatprep.subr.bf16.mxu0 %v1585_v32  ;;  %v1630_v32 = vld [vmem:[#allocation5 + $0x100] ss:$8 sps:$4 sm:$0xff]  }
  0x60   :  { %444 = vmatpush1.bf16.msra.mxu0 %v1583_v33  ;;  %v1633_v33 = vld [vmem:[#allocation7 + $0xb8] sm:$0xff]  }
  0x61   :  { %445 = vmatprep.subr.bf16.mxu0 %v1588_v34  ;;  %v1634_v34 = vld [vmem:[#allocation7 + $0xb0] sm:$0xff]  }
  0x64   :  { %446 = vmatpush1.bf16.msra.mxu0 %v1586_v35  ;;  %v1635_v35 = vld [vmem:[#allocation7 + $0xa8] sm:$0xff]  }
  0x65   :  { %447 = vmatprep.subr.bf16.mxu0 %v1591_v36  ;;  %v1636_v36 = vld [vmem:[#allocation7 + $0xa0] sm:$0xff]  }
  0x68   :  { %448 = vmatpush1.bf16.msra.mxu0 %v1589_v37  ;;  %v1637_v37 = vld [vmem:[#allocation7 + $0x98] sm:$0xff]  }
  0x69   :  { %449 = vmatprep.subr.bf16.mxu0 %v1594_v38  ;;  %v1638_v38 = vld [vmem:[#allocation7 + $0x90] sm:$0xff]  }
  0x6c   :  { %450 = vmatpush1.bf16.msra.mxu0 %v1592_v39  ;;  %v1315_v39 = vld [vmem:[#allocation8 + $0x4] ss:$0 sm:$0xff] }
  0x6d   :  { %451 = vmatprep.subr.bf16.mxu0 %v1597_v48  ;;  %v1639_v48 = vld [vmem:[#allocation7 + $0x88] sm:$0xff]  }
  0x70   :  { %452 = vmatpush1.bf16.msra.mxu0 %v1595_v49  ;;  %v1640_v49 = vld [vmem:[#allocation7 + $0x80] sm:$0xff]  }
  0x71   :  { %453 = vmatprep.subr.bf16.mxu0 %v1600_v50  ;;  %v1641_v50 = vld [vmem:[#allocation5 + $0x1f0] ss:$8 sps:$4 sm:$0xff]  }
  0x74   :  { %454 = vmatpush1.bf16.msra.mxu0 %v1598_v51  ;;  %v1643_v51 = vld [vmem:[#allocation5 + $0x1f4] ss:$8 sps:$4 sm:$0xff]  }
  0x75   :  { %697 = vmatprep.subr.bf16.mxu0 %v1611_v10  ;;  %v1662_v10 = vld [vmem:[#allocation5 + $0x180] ss:$8 sps:$4 sm:$0xff]  }
 0x117   :  { %v209_v41 = vpop.f32.mrf.mxu0 }
 0x118   :  { %v220_v42 = vadd.f32 %v1287_v40, %v209_v41 }
 0x119   :  { %v211_v43 = vpop.f32.mrf.mxu0 }
 0x11a   :  { %v221_v44 = vmax.f32 %v220_v42, 0.0  ;;  %v227_v61 = vadd.f32 %v1288_v58, %v211_v43  ;;  %v1653_v58 = vld [vmem:[#allocation5 + $0x1b0] ss:$8 sps:$4 sm:$0xff]  }
 0x11b   :  { %v213_v45 = vpop.f32.mrf.mxu0 }
 0x11c   :  { %v228_v46 = vpack.c.bf16 %v221_v44, %v221_v44 }
 0x11d   :  { %v214_v47 = vpop.f32.mrf.mxu0 }
 0x11e   :  { %1449 = vmatmul.mubr.bf16.vlgmr.msra.gmra.mxu1 %v228_v46 }
 0x11f   :  { %1468 = vmatprep.mubr.msk.bf16.mxu1 %vm1821_vm0, %v1820_v1  ;;  %1453 = vmatpush3.bf16.msra.mxu1 %v1601_v52  ;;  %v1646_v52 = vld [vmem:[#allocation5 + $0x1e4] ss:$8 sps:$4 sm:$0xff]  }
 0x120   :  { %1454 = vmatprep.subr.bf16.mxu1 %v1820_v1 }
 0x123   :  { %1455 = vmatpush3.bf16.msra.mxu1 %v1602_v53  ;;  %v1644_v53 = vld [vmem:[#allocation5 + $0x1e0] ss:$8 sps:$4 sm:$0xff]  }
 0x124   :  { %1456 = vmatprep.subr.bf16.mxu1 %v1820_v1 }
 0x127   :  { %1457 = vmatpush3.bf16.msra.mxu1 %v1603_v54  ;;  %v1649_v54 = vld [vmem:[#allocation5 + $0x1d4] ss:$8 sps:$4 sm:$0xff]  }
 0x128   :  { %1458 = vmatprep.subr.bf16.mxu1 %v1820_v1 }
 0x12b   :  { %1459 = vmatpush3.bf16.msra.mxu1 %v1604_v55  ;;  %v1647_v55 = vld [vmem:[#allocation5 + $0x1d0] ss:$8 sps:$4 sm:$0xff]  }
 0x12c   :  { %1460 = vmatprep.subr.bf16.mxu1 %v1820_v1 }
 0x12f   :  { %1461 = vmatpush3.bf16.msra.mxu1 %v1605_v56  ;;  %v1650_v56 = vld [vmem:[#allocation5 + $0x1c0] ss:$8 sps:$4 sm:$0xff]  }
 0x130   :  { %1462 = vmatprep.subr.bf16.mxu1 %v1820_v1 }
 0x133   :  { %1463 = vmatpush3.bf16.msra.mxu1 %v1606_v57  ;;  %v1655_v57 = vld [vmem:[#allocation5 + $0x1b4] ss:$8 sps:$4 sm:$0xff]  }
 0x134   :  { %1464 = vmatprep.subr.bf16.mxu1 %v1820_v1 }
 0x137   :  { %1465 = vmatpush3.bf16.msra.mxu1 %v1607_v7  ;;  %v1661_v7 = vld [vmem:[#allocation5 + $0x194] ss:$8 sps:$4 sm:$0xff]  }
 0x138   :  { %1466 = vmatprep.subr.bf16.mxu1 %v1820_v1 }
 0x13b   :  { %1467 = vmatpush3.bf16.msra.mxu1 %v1608_v8  ;;  %v1659_v8 = vld [vmem:[#allocation5 + $0x190] ss:$8 sps:$4 sm:$0xff]  }
 0x13c   :  { %1472 = vmatprep.subr.bf16.mxu1 %v1820_v1 }
 0x1de   :  { %v331_v60 = vpop.f32.mrf.mxu1 }
 0x1df   :  { %v332_v62 = vadd.f32 %v1289_v59, %v331_v60  ;;  %v1658_v59 = vld [vmem:[#allocation5 + $0x1a4] ss:$8 sps:$4 sm:$0xff]   ;;  %v1656_v60 = vld [vmem:[#allocation5 + $0x1a0] ss:$8 sps:$4 sm:$0xff]  }
 0x1e0   :  { %v1450_v63 = vpop.f32.mrf.mxu1 }
 0x1e1   :  { %v337_v2 = vadd.f32 %v332_v62, %v227_v61  ;;  %v1340_v61 = vld [vmem:[#allocation8 + $0x5] ss:$0 sm:$0xff] }
 0x1e2   :  { %v334_v3 = vpop.f32.mrf.mxu1 }
 0x1e3   :  { %v1893_v4 = vmax.f32 %v337_v2, 0.0 }
 0x1e4   :  { %v1451_v5 = vpop.f32.mrf.mxu1 }
 0x1e5   :  { %v341_v6 = vpack.c.bf16 %v1893_v4, %v1893_v4 }
 0x1e7   :  { %472 = vmatmul.mubr.bf16.vlgmr.msra.gmra.mxu0 %v341_v6 }
 0x1e8   :  { %729 = vmatprep.mubr.bf16.mxu0 %v1819_v0  ;;  %698 = vmatpush1.bf16.msra.mxu0 %v1609_v9  ;;  %v1664_v9 = vld [vmem:[#allocation5 + $0x184] ss:$8 sps:$4 sm:$0xff]  }
 0x1e9   :  { %699 = vmatprep.subr.bf16.mxu0 %v1614_v11  ;;  %v1665_v11 = vld [vmem:[#allocation7 + $0xf8] sm:$0xff]  }
 0x1ec   :  { %700 = vmatpush1.bf16.msra.mxu0 %v1612_v12  ;;  %v1666_v12 = vld [vmem:[#allocation7 + $0xf0] sm:$0xff]  }
 0x1ed   :  { %701 = vmatprep.subr.bf16.mxu0 %v1617_v13  ;;  %v1667_v13 = vld [vmem:[#allocation7 + $0xe8] sm:$0xff]  }
 0x1f0   :  { %702 = vmatpush1.bf16.msra.mxu0 %v1615_v14  ;;  %v1668_v14 = vld [vmem:[#allocation7 + $0xe0] sm:$0xff]  }
 0x1f1   :  { %703 = vmatprep.subr.bf16.mxu0 %v1620_v15  ;;  %v1669_v15 = vld [vmem:[#allocation7 + $0xd8] sm:$0xff]  }
 0x1f4   :  { %704 = vmatpush1.bf16.msra.mxu0 %v1618_v16  ;;  %v1670_v16 = vld [vmem:[#allocation7 + $0xd0] sm:$0xff]  }
 0x1f5   :  { %705 = vmatprep.subr.bf16.mxu0 %v1623_v17  ;;  %v1341_v17 = vld [vmem:[#allocation8 + $0x7] ss:$0 sm:$0xff] }
 0x1f8   :  { %706 = vmatpush1.bf16.msra.mxu0 %v1621_v18  ;;  %v1342_v18 = vld [vmem:[#allocation8 + $0x6] ss:$0 sm:$0xff] }
 0x1f9   :  { %707 = vmatprep.subr.bf16.mxu0 %v1626_v19 }
 0x1fc   :  { %708 = vmatpush1.bf16.msra.mxu0 %v1624_v20 }
 0x1fd   :  { %709 = vmatprep.subr.bf16.mxu0 %v1629_v29  ;;  %v1672_v29 = vld [vmem:[#allocation7 + $0xc0] sm:$0xff]  }
 0x200   :  { %710 = vmatpush1.bf16.msra.mxu0 %v1627_v30  ;;  %v1673_v30 = vld [vmem:[#allocation7 + $0x138] sm:$0xff]  }
 0x201   :  { %711 = vmatprep.subr.bf16.mxu0 %v1632_v31  ;;  %v1674_v31 = vld [vmem:[#allocation7 + $0x130] sm:$0xff]  }
 0x204   :  { %712 = vmatpush1.bf16.msra.mxu0 %v1630_v32  ;;  %v1675_v32 = vld [vmem:[#allocation7 + $0x128] sm:$0xff]  }
 0x205   :  { %962 = vmatprep.subr.bf16.mxu0 %v1643_v51 }
 0x2a7   :  { %v473_v22 = vpop.f32.mrf.mxu0 }
 0x2a8   :  { %v483_v23 = vadd.f32 %v1314_v21, %v473_v22 }
 0x2a9   :  { %v475_v24 = vpop.f32.mrf.mxu0 }
 0x2aa   :  { %v484_v25 = vmax.f32 %v483_v23, 0.0 }
 0x2ab   :  { %v476_v26 = vpop.f32.mrf.mxu0 }
 0x2ac   :  { %v485_v27 = vpack.c.bf16 %v484_v25, %v484_v25 }
 0x2ad   :  { %v477_v28 = vpop.f32.mrf.mxu0 }
 0x2ae   :  { %1469 = vmatmul.mubr.bf16.vlgmr.msra.gmra.mxu1 %v485_v27  ;;  %v1671_v28 = vld [vmem:[#allocation7 + $0xc8] sm:$0xff]  }
 0x2af   :  { %1488 = vmatprep.mubr.msk.bf16.mxu1 %vm1821_vm0, %v1820_v1  ;;  %1473 = vmatpush3.bf16.msra.mxu1 %v1633_v33  ;;  %v1676_v33 = vld [vmem:[#allocation7 + $0x120] sm:$0xff]  }
 0x2b0   :  { %1474 = vmatprep.subr.bf16.mxu1 %v1820_v1 }
 0x2b3   :  { %1475 = vmatpush3.bf16.msra.mxu1 %v1634_v34  ;;  %v1677_v34 = vld [vmem:[#allocation7 + $0x118] sm:$0xff]  }
 0x2b4   :  { %1476 = vmatprep.subr.bf16.mxu1 %v1820_v1 }
 0x2b7   :  { %1477 = vmatpush3.bf16.msra.mxu1 %v1635_v35  ;;  %v1678_v35 = vld [vmem:[#allocation7 + $0x110] sm:$0xff]  }
 0x2b8   :  { %1478 = vmatprep.subr.bf16.mxu1 %v1820_v1 }
 0x2bb   :  { %1479 = vmatpush3.bf16.msra.mxu1 %v1636_v36  ;;  %v1367_v36 = vld [vmem:[#allocation8 + $0x8] ss:$0 sm:$0xff] }
 0x2bc   :  { %1480 = vmatprep.subr.bf16.mxu1 %v1820_v1 }
 0x2bf   :  { %1481 = vmatpush3.bf16.msra.mxu1 %v1637_v37 }
 0x2c0   :  { %1482 = vmatprep.subr.bf16.mxu1 %v1820_v1 }
 0x2c3   :  { %1483 = vmatpush3.bf16.msra.mxu1 %v1638_v38 }
 0x2c4   :  { %1484 = vmatprep.subr.bf16.mxu1 %v1820_v1 }
 0x2c7   :  { %1485 = vmatpush3.bf16.msra.mxu1 %v1639_v48 }
 0x2c8   :  { %1486 = vmatprep.subr.bf16.mxu1 %v1820_v1 }
 0x2cb   :  { %1487 = vmatpush3.bf16.msra.mxu1 %v1640_v49 }
 0x2cc   :  { %1492 = vmatprep.subr.bf16.mxu1 %v1820_v1 }
 0x36e   :  { %v589_v40 = vpop.f32.mrf.mxu1 }
 0x36f   :  { %v590_v41 = vadd.f32 %v1315_v39, %v589_v40 }
 0x370   :  { %v1470_v42 = vpop.f32.mrf.mxu1 }
 0x371   :  { %v595_v43 = vadd.f32 %v590_v41, %v1893_v4 }
 0x372   :  { %v592_v44 = vpop.f32.mrf.mxu1 }
 0x373   :  { %v596_v45 = vmax.f32 %v595_v43, 0.0  ;;  %v1679_v44 = vld [vmem:[#allocation7 + $0x108] sm:$0xff]  }
 0x374   :  { %v1471_v46 = vpop.f32.mrf.mxu1 }
 0x375   :  { %v599_v47 = vpack.c.bf16 %v596_v45, %v596_v45  ;;  %v1680_v45 = vld [vmem:[#allocation7 + $0x100] sm:$0xff]   ;;  %v1368_v46 = vld [vmem:[#allocation8 + $0xa] ss:$0 sm:$0xff] }
 0x377   :  { %730 = vmatmul.mubr.bf16.vlgmr.msra.gmra.mxu0 %v599_v47  ;;  %v1369_v47 = vld [vmem:[#allocation8 + $0x9] ss:$0 sm:$0xff] }
 0x378   :  { %994 = vmatprep.mubr.bf16.mxu0 %v1819_v0  ;;  %963 = vmatpush1.bf16.msra.mxu0 %v1641_v50  ;;  %v1652_v0 = vld [vmem:[#allocation5 + $0x1c4] ss:$8 sps:$4 sm:$0xff]  }
 0x379   :  { %964 = vmatprep.subr.bf16.mxu0 %v1646_v52 }
 0x37c   :  { %965 = vmatpush1.bf16.msra.mxu0 %v1644_v53 }
 0x37d   :  { %966 = vmatprep.subr.bf16.mxu0 %v1649_v54 }
 0x380   :  { %967 = vmatpush1.bf16.msra.mxu0 %v1647_v55 }
 0x381   :  { %968 = vmatprep.subr.bf16.mxu0 %v1652_v0 }
 0x384   :  { %969 = vmatpush1.bf16.msra.mxu0 %v1650_v56 }
 0x385   :  { %970 = vmatprep.subr.bf16.mxu0 %v1655_v57 }
 0x388   :  { %971 = vmatpush1.bf16.msra.mxu0 %v1653_v58 }
 0x389   :  { %972 = vmatprep.subr.bf16.mxu0 %v1658_v59 }
 0x38c   :  { %973 = vmatpush1.bf16.msra.mxu0 %v1656_v60 }
 0x38d   :  { %974 = vmatprep.subr.bf16.mxu0 %v1661_v7 }
 0x390   :  { %975 = vmatpush1.bf16.msra.mxu0 %v1659_v8 }
 0x391   :  { %976 = vmatprep.subr.bf16.mxu0 %v1664_v9 }
 0x394   :  { %977 = vmatpush1.bf16.msra.mxu0 %v1662_v10 }
 0x395   :  { %1512 = vmatprep.subr.bf16.mxu0 %v1820_v1 }
 0x437   :  { %v731_v62 = vpop.f32.mrf.mxu0 }
 0x438   :  { %v742_v63 = vadd.f32 %v1340_v61, %v731_v62 }
 0x439   :  { %v733_v2 = vpop.f32.mrf.mxu0 }
 0x43a   :  { %v743_v3 = vmax.f32 %v742_v63, 0.0  ;;  %v749_v20 = vadd.f32 %v1341_v17, %v733_v2 }
 0x43b   :  { %v735_v4 = vpop.f32.mrf.mxu0 }
 0x43c   :  { %v750_v5 = vpack.c.bf16 %v743_v3, %v743_v3 }
 0x43d   :  { %v736_v6 = vpop.f32.mrf.mxu0 }
 0x43e   :  { %1489 = vmatmul.mubr.bf16.vlgmr.msra.gmra.mxu1 %v750_v5 }
 0x43f   :  { %1508 = vmatprep.mubr.msk.bf16.mxu1 %vm1821_vm0, %v1820_v1  ;;  %1493 = vmatpush3.bf16.msra.mxu1 %v1665_v11 }
 0x440   :  { %1494 = vmatprep.subr.bf16.mxu1 %v1820_v1 }
 0x443   :  { %1495 = vmatpush3.bf16.msra.mxu1 %v1666_v12 }
 0x444   :  { %1496 = vmatprep.subr.bf16.mxu1 %v1820_v1 }
 0x447   :  { %1497 = vmatpush3.bf16.msra.mxu1 %v1667_v13 }
 0x448   :  { %1498 = vmatprep.subr.bf16.mxu1 %v1820_v1 }
 0x44b   :  { %1499 = vmatpush3.bf16.msra.mxu1 %v1668_v14 }
 0x44c   :  { %1500 = vmatprep.subr.bf16.mxu1 %v1820_v1 }
 0x44f   :  { %1501 = vmatpush3.bf16.msra.mxu1 %v1669_v15 }
 0x450   :  { %1502 = vmatprep.subr.bf16.mxu1 %v1820_v1 }
 0x453   :  { %1503 = vmatpush3.bf16.msra.mxu1 %v1670_v16 }
 0x454   :  { %1504 = vmatprep.subr.bf16.mxu1 %v1820_v1 }
 0x457   :  { %1505 = vmatpush3.bf16.msra.mxu1 %v1671_v28 }
 0x458   :  { %1506 = vmatprep.subr.bf16.mxu1 %v1820_v1 }
 0x45b   :  { %1507 = vmatpush3.bf16.msra.mxu1 %v1672_v29 }
 0x4fe   :  { %v854_v19 = vpop.f32.mrf.mxu1 }
 0x4ff   :  { %v855_v21 = vadd.f32 %v1342_v18, %v854_v19 }
 0x500   :  { %v1490_v22 = vpop.f32.mrf.mxu1 }
 0x501   :  { %v860_v23 = vadd.f32 %v855_v21, %v749_v20 }
 0x502   :  { %v857_v24 = vpop.f32.mrf.mxu1 }
 0x503   :  { %v861_v25 = vmax.f32 %v860_v23, 0.0 }
 0x504   :  { %v1491_v26 = vpop.f32.mrf.mxu1 }
 0x505   :  { %v864_v27 = vpack.c.bf16 %v861_v25, %v861_v25 }
 0x507   :  { %995 = vmatmul.mubr.bf16.vlgmr.msra.gmra.mxu0 %v864_v27 }
 0x508   :  { %1528 = vmatprep.mubr.msk.bf16.mxu0 %vm1821_vm0, %v1820_v1  ;;  %1513 = vmatpush3.bf16.msra.mxu0 %v1673_v30 }
 0x509   :  { %1514 = vmatprep.subr.bf16.mxu0 %v1820_v1 }
 0x50c   :  { %1515 = vmatpush3.bf16.msra.mxu0 %v1674_v31 }
 0x50d   :  { %1516 = vmatprep.subr.bf16.mxu0 %v1820_v1 }
 0x510   :  { %1517 = vmatpush3.bf16.msra.mxu0 %v1675_v32 }
 0x511   :  { %1518 = vmatprep.subr.bf16.mxu0 %v1820_v1 }
 0x514   :  { %1519 = vmatpush3.bf16.msra.mxu0 %v1676_v33 }
 0x515   :  { %1520 = vmatprep.subr.bf16.mxu0 %v1820_v1 }
 0x518   :  { %1521 = vmatpush3.bf16.msra.mxu0 %v1677_v34 }
 0x519   :  { %1522 = vmatprep.subr.bf16.mxu0 %v1820_v1 }
 0x51c   :  { %1523 = vmatpush3.bf16.msra.mxu0 %v1678_v35 }
 0x51d   :  { %1524 = vmatprep.subr.bf16.mxu0 %v1820_v1 }
 0x520   :  { %1525 = vmatpush3.bf16.msra.mxu0 %v1679_v44 }
 0x521   :  { %1526 = vmatprep.subr.bf16.mxu0 %v1820_v1 }
 0x524   :  { %1527 = vmatpush3.bf16.msra.mxu0 %v1680_v45 }
 0x5c7   :  { %v996_v37 = vpop.f32.mrf.mxu0 }
 0x5c8   :  { %v1007_v38 = vadd.f32 %v1367_v36, %v996_v37 }
 0x5c9   :  { %v998_v39 = vpop.f32.mrf.mxu0 }
 0x5ca   :  { %v1008_v40 = vmax.f32 %v1007_v38, 0.0  ;;  %v1014_v49 = vadd.f32 %v1368_v46, %v998_v39 }
 0x5cb   :  { %v1000_v41 = vpop.f32.mrf.mxu0 }
 0x5cc   :  { %v1015_v42 = vpack.c.bf16 %v1008_v40, %v1008_v40 }
 0x5cd   :  { %v1001_v43 = vpop.f32.mrf.mxu0 }
 0x5ce   :  { %1509 = vmatmul.mubr.bf16.vlgmr.msra.gmra.mxu1 %v1015_v42 }
 0x68e   :  { %v1119_v48 = vpop.f32.mrf.mxu1 }
 0x68f   :  { %v1120_v50 = vadd.f32 %v1369_v47, %v1119_v48 }
 0x690   :  { %v1510_v51 = vpop.f32.mrf.mxu1 }
 0x691   :  { %v1125_v52 = vadd.f32 %v1120_v50, %v1014_v49 }
 0x692   :  { %v1122_v53 = vpop.f32.mrf.mxu1 }
 0x693   :  { %v1126_v54 = vmax.f32 %v1125_v52, 0.0 }
 0x694   :  { %v1511_v55 = vpop.f32.mrf.mxu1 }
 0x695   :  { %v1128_v0 = vpack.c.bf16 %v1126_v54, %v1126_v54  ;;  %1127 = vst [vmem:[#allocation11] sm:$0xff] %v1126_v54 }
 0x697   :  { %1529 = vmatmul.mubr.bf16.vlgmr.msra.gmra.mxu0 %v1128_v0 }
 0x698   :  { %1772 = shalt.err (!%p1769_p10)
}
 0x699   :  { %1259 = dma.vmem_to_hbm [thread:$0]  %s1257_s3, 128, %s1942_s5, [#allocation12]   ;;  %v1378_v1 = vld [vmem:[#allocation8 + $0xb] ss:$0 sm:$0xff] }
 0x69a   :  { %s1823_s18 = smov [#allocation10]  }
 0x69b   :  { %s1246_s19 = sshll.u32 %s1823_s18, 4  ;;  %s1247_s19 = int_to_ptr.vmem [resolvable:$true] %s1246_s19 }
 0x69c   :  { %s1781_s20 = scalar_lea.vmem %s1247_s19, 128  ;;  %p1786_p12 = scmp.lt.s32.totalorder %s1247_s19, %s1247_s19 }
 0x69d   :  { %p1782_p11 = scmp.ne.s32.totalorder %s1247_s19, %s1781_s20  ;;  %p1787_p13 = scmp.lt.s32.totalorder %s1781_s20, %s1781_s20 }
 0x69f   :  { %p1788_p0 = por %p1787_p13, %p1786_p12 }
 0x6a1   :  { %p1789_p1 = pnand %p1788_p0, %p1782_p11 }
 0x757   :  { %v1233_v56 = vpop.f32.mrf.mxu0 }
 0x758   :  { %v1234_v57 = vadd.f32 %v1378_v1, %v1233_v56 }
 0x759   :  { %v1530_v58 = vpop.f32.mrf.mxu0 }
 0x75a   :  { %1239 = vst [vmem:[#allocation10] sm:$0xff] %v1234_v57 }
 0x75b   :  { %v1236_v59 = vpop.f32.mrf.mxu0 }
 0x75c   :  { %1792 = shalt.err (!%p1789_p1)
}
 0x75d   :  { %1249 = dma.vmem_to_hbm [thread:$0]  %s1247_s19, 128, %s1941_s4, [#allocation4]   ;;  %v1531_v60 = vpop.f32.mrf.mxu0 }
 0x75e   :  { %1807 = dma.done.wait [#allocation4], 128  }
 0x75f   :  { %1808 = vsyncadd [#allocation4], 4294967168 }
 0x760   :  { %1809 = dma.done.wait [#allocation12], 128  }
 0x761   :  { %1810 = vsyncadd [#allocation12], 4294967168 }
 0x762   :  { %1266 = vsyncpa [#allocation3], 1 }
 0x763   :  { %1267 = vsyncpa [#allocation6], 1 }
 0x764   :  { %1268 = vsyncpa [#allocation9], 1 }
 0x765   :  { %1269 = vsyncpa [#allocation4], 1 }
 0x766   :  { %1270 = vsyncpa [#allocation12], 1 }

</bundles_post_ra>
